<compile_context>
chip_gen: v5e
topology: v5e:2x2
jax: 0.10.0
libtpu: 0.0.40
codegen_flags: <defaults>
</compile_context>

<pallas_src>
import functools

import jax
import jax.numpy as jnp
from jax.experimental import pallas as pl
from jax.experimental.pallas import tpu as pltpu


def _gat_row_tile_kernel(wh1_ref, wh2_ref, adj_ref, attn_ref, e_ref, *, alpha):
    # e = LeakyReLU(wh1 + wh2^T) for this tile's rows against all columns.
    e_raw = wh1_ref[...] + wh2_ref[...]                   # (TM, 1)+(1, N) -> (TM, N)
    # 0 < alpha < 1  =>  LeakyReLU(x) == max(x, alpha*x)  (drops compare+select).
    e = jnp.maximum(e_raw, alpha * e_raw)
    e_ref[...] = e

    # Masked softmax over the last (lane) axis.  Single hoisted mask.
    mask = adj_ref[...] != 0
    neg_big = jnp.float32(-9000000000000000.0)            # matches torch ref sentinel
    masked = jnp.where(mask, e, neg_big)
    m = jnp.max(masked, axis=-1, keepdims=True)
    # Mask-before-exp: masked lanes contribute exactly 0 to the sum.  (exp is
    # still evaluated on every lane -- the select just discards it, so a stray
    # +inf on a masked lane is harmless and never turns into inf-inf/NaN.)
    p = jnp.where(mask, jnp.exp(e - m), jnp.float32(0.0))
    s = jnp.sum(p, axis=-1, keepdims=True)
    # Guard fully-masked / padding rows (rows with >= 1 neighbor are unaffected).
    s = jnp.maximum(s, jnp.float32(1e-30))
    attn_ref[...] = p * pl.reciprocal(s, approx=False)


def _round_up(x, m):
    return ((x + m - 1) // m) * m


def _vmem_capacity_bytes():
    try:
        cap = getattr(pltpu.get_tpu_info(), "vmem_capacity_bytes", None)
        if cap:
            return int(cap)
    except Exception:
        pass
    return 64 * 1024 * 1024   # conservative fallback: v7x per-TensorCore VMEM


def _choose_row_tile(n_rows, n_cols, adj_bytes, budget):
    # Per output row each pipeline step keeps: adj + attn(f32) + e(f32), double
    # buffered, plus ~5 f32-sized compute temporaries.
    bytes_per_row = max(1, n_cols * (2 * (adj_bytes + 4 + 4) + 5 * 4))
    tm = budget // bytes_per_row
    if tm >= 128:
        tm = (tm // 128) * 128
    else:
        tm = (tm // 8) * 8
    tm = max(8, min(int(tm), 2048, n_rows))
    # v7x megacore: keep >= 2 grid steps so "parallel" feeds both TensorCores.
    if n_rows >= 256 and tm > n_rows // 2:
        half = n_rows // 2
        tm = (half // 128) * 128 if half >= 128 else max(8, (half // 8) * 8)
    return tm
    # TODO(synk): for extremely large graphs, add a column-block grid axis with
    # a two-pass softmax instead of shrinking TM toward the 8-row floor.


def gat_forward(h, adj, W, a, alpha):
    """attention, e  ==  GraphAttention.forward(h, adj) of the PyTorch spec."""
    n, _ = h.shape
    f_out = W.shape[1]

    h32 = h.astype(jnp.float32)
    W32 = W.astype(jnp.float32)
    a32 = a.astype(jnp.float32)

    # O(N*F) pre-pass in plain XLA: both attention projections hoisted out of
    # the N^2 kernel (keeps the MXU / cross-lane reduces out of the grid loop).
    wh = h32 @ W32                                   # (n, f_out)
    wh1 = wh @ a32[:f_out, :]                        # (n, 1)
    wh2 = (wh @ a32[f_out:, :]).reshape(1, n)        # (1, n)

    aligned = (n % 128 == 0)
    if aligned:
        n_pad = n
        # Zero extra HBM passes: adj consumed in its native dtype, outputs
        # written directly at (n, n).
        adj_in = adj.astype(jnp.int8) if adj.dtype == jnp.bool_ else adj
        wh1_in, wh2_in = wh1, wh2
    else:
        # TODO(synk): handle ragged N fully in-kernel (iota column mask +
        # partial-block stores) to kill this O(N^2) pad/slice; large-graph
        # callers should pass 128-aligned inputs to hit the fast path above.
        n_pad = _round_up(n, 128)
        pad = n_pad - n
        adj_in = jnp.pad((adj != 0).astype(jnp.int8), ((0, pad), (0, pad)))
        wh1_in = jnp.pad(wh1, ((0, pad), (0, 0)))
        wh2_in = jnp.pad(wh2, ((0, 0), (0, pad)))

    adj_bytes = jnp.dtype(adj_in.dtype).itemsize
    vmem_cap = _vmem_capacity_bytes()
    # ~48 MiB usable on v7x (64 MiB parts), ~96-100 MiB on v5e/v6e (128 MiB).
    vmem_limit = int(min(vmem_cap * 3 // 4, 100 * 1024 * 1024))
    budget = vmem_limit * 3 // 4
    tm = _choose_row_tile(n_pad, n_pad, adj_bytes, budget)

    kernel = functools.partial(_gat_row_tile_kernel, alpha=float(alpha))
    grid = (pl.cdiv(n_pad, tm),)

    attn, e = pl.pallas_call(
        kernel,
        out_shape=(
            jax.ShapeDtypeStruct((n_pad, n_pad), jnp.float32),
            jax.ShapeDtypeStruct((n_pad, n_pad), jnp.float32),
        ),
        grid_spec=pltpu.PrefetchScalarGridSpec(
            num_scalar_prefetch=0,
            grid=grid,
            in_specs=[
                pl.BlockSpec((tm, 1), lambda i: (i, 0)),       # wh1 column tile
                pl.BlockSpec((1, n_pad), lambda i: (0, 0)),    # wh2 row (resident)
                pl.BlockSpec((tm, n_pad), lambda i: (i, 0)),   # adj tile
            ],
            out_specs=(
                pl.BlockSpec((tm, n_pad), lambda i: (i, 0)),   # attention
                pl.BlockSpec((tm, n_pad), lambda i: (i, 0)),   # e
            ),
        ),
        compiler_params=pltpu.CompilerParams(
            dimension_semantics=("parallel",),
            vmem_limit_bytes=vmem_limit,
        ),
    )(wh1_in, wh2_in, adj_in)

    if aligned:
        return attn, e
    return attn[:n, :n], e[:n, :n]


def _xavier_uniform(key, shape, gain):
    fan_in, fan_out = shape[0], shape[1]
    limit = gain * jnp.sqrt(6.0 / (fan_in + fan_out))
    return jax.random.uniform(key, shape, jnp.float32, -limit, limit)


if __name__ == "__main__":
    # Small shapes consistent with the module's forward.
    N = 8            # number of graph nodes
    IN_FEATURES = 32
    OUT_FEATURES = 16
    ALPHA = 0.2      # LeakyReLU negative slope

    key = jax.random.PRNGKey(0)
    k_w, k_a, k_h, k_adj = jax.random.split(key, 4)

    # Deterministic parameter init (xavier_uniform with gain=1.414, as in __init__).
    W = _xavier_uniform(k_w, (IN_FEATURES, OUT_FEATURES), 1.414)
    a = _xavier_uniform(k_a, (2 * OUT_FEATURES, 1), 1.414)

    # Example inputs.
    h = jax.random.normal(k_h, (N, IN_FEATURES), dtype=jnp.float32)
    adj = (jax.random.uniform(k_adj, (N, N)) > 0.5).astype(jnp.float32)
    # Ensure every row has at least one neighbor (self-loop), like typical GAT usage.
    adj = jnp.maximum(adj, jnp.eye(N, dtype=jnp.float32))

    attention, e = gat_forward(h, adj, W, a, ALPHA)
    jax.block_until_ready((attention, e))

    # Lightweight sanity check against a pure-JAX reference.
    wh_ref = h @ W
    wh1_ref = wh_ref @ a[:OUT_FEATURES]
    wh2_ref = wh_ref @ a[OUT_FEATURES:]
    e_raw_ref = wh1_ref + wh2_ref.T
    e_ref = jnp.where(e_raw_ref > 0, e_raw_ref, ALPHA * e_raw_ref)
    att_ref = jax.nn.softmax(jnp.where(adj > 0, e_ref, -9e15), axis=1)
    assert jnp.allclose(e, e_ref, atol=1e-4), "e mismatch"
    assert jnp.allclose(attention, att_ref, atol=1e-4), "attention mismatch"

    print("KERNEL_OK")
</pallas_src>

<mosaic_0001>
module attributes {stable_mosaic.version = 11 : i64} {
  func.func @_gat_row_tile_kernel(%arg0: i32, %arg1: memref<128x1xf32, #tpu.memory_space<vmem>>, %arg2: memref<1x128xf32, #tpu.memory_space<vmem>>, %arg3: memref<128x128xi8, #tpu.memory_space<vmem>>, %arg4: memref<128x128xf32, #tpu.memory_space<vmem>>, %arg5: memref<128x128xf32, #tpu.memory_space<vmem>>) attributes {dimension_semantics = [#tpu.dimension_semantics<parallel>], iteration_bounds = array<i64: 1>, scalar_prefetch = 0 : i64, scratch_operands = 0 : i64, tpu.core_type = #tpu.core_type<tc>, window_params = [{transform_indices = @transform_0, window_bounds = array<i64: 128, 1>}, {pipeline_mode = #tpu.pipeline_mode<synchronous>, transform_indices = @transform_1, window_bounds = array<i64: 1, 128>}, {transform_indices = @transform_2, window_bounds = array<i64: 128, 128>}, {transform_indices = @transform_3, window_bounds = array<i64: 128, 128>}, {transform_indices = @transform_4, window_bounds = array<i64: 128, 128>}]} {
    %c0 = arith.constant 0 : index
    %c0_0 = arith.constant 0 : index
    %0 = vector.load %arg1[%c0, %c0_0] : memref<128x1xf32, #tpu.memory_space<vmem>>, vector<128x1xf32>
    %c0_1 = arith.constant 0 : index
    %c0_2 = arith.constant 0 : index
    %1 = vector.load %arg2[%c0_1, %c0_2] : memref<1x128xf32, #tpu.memory_space<vmem>>, vector<1x128xf32>
    %2 = vector.broadcast %0 : vector<128x1xf32> to vector<128x128xf32>
    %3 = vector.broadcast %1 : vector<1x128xf32> to vector<128x128xf32>
    %4 = arith.addf %2, %3 : vector<128x128xf32>
    %cst = arith.constant 2.000000e-01 : f32
    %5 = vector.broadcast %cst : f32 to vector<128x128xf32>
    %6 = arith.mulf %5, %4 : vector<128x128xf32>
    %7 = arith.maximumf %4, %6 : vector<128x128xf32>
    %c0_3 = arith.constant 0 : index
    %c0_4 = arith.constant 0 : index
    %8 = vector.load %arg5[%c0_3, %c0_4] : memref<128x128xf32, #tpu.memory_space<vmem>>, vector<128x128xf32>
    tpu.vector_store %arg5[%c0_3, %c0_4], %7 {strides = array<i32>} : memref<128x128xf32, #tpu.memory_space<vmem>>, vector<128x128xf32>,
    %c0_5 = arith.constant 0 : index
    %c0_6 = arith.constant 0 : index
    %9 = vector.load %arg3[%c0_5, %c0_6] : memref<128x128xi8, #tpu.memory_space<vmem>>, vector<128x128xi8>
    %c0_i8 = arith.constant 0 : i8
    %10 = vector.broadcast %c0_i8 : i8 to vector<128x128xi8>
    %11 = arith.cmpi ne, %9, %10 : vector<128x128xi8>
    %cst_7 = arith.constant -9.000000e+15 : f32
    %12 = vector.broadcast %cst_7 : f32 to vector<128x128xf32>
    %13 = arith.select %11, %7, %12 : vector<128x128xi1>, vector<128x128xf32>
    %cst_8 = arith.constant dense<0xFF800000> : vector<128xf32>
    %14 = vector.multi_reduction <maximumf>, %13, %cst_8 [1] : vector<128x128xf32> to vector<128xf32>
    %15 = vector.shape_cast %14 : vector<128xf32> to vector<128x1xf32>
    %16 = vector.broadcast %15 : vector<128x1xf32> to vector<128x128xf32>
    %17 = arith.subf %7, %16 : vector<128x128xf32>
    %18 = math.exp %17 : vector<128x128xf32>
    %cst_9 = arith.constant 0.000000e+00 : f32
    %19 = vector.broadcast %cst_9 : f32 to vector<128x128xf32>
    %20 = arith.select %11, %18, %19 : vector<128x128xi1>, vector<128x128xf32>
    %cst_10 = arith.constant dense<0.000000e+00> : vector<128xf32>
    %21 = vector.multi_reduction <add>, %20, %cst_10 [1] : vector<128x128xf32> to vector<128xf32>
    %22 = vector.shape_cast %21 : vector<128xf32> to vector<128x1xf32>
    %cst_11 = arith.constant 1.000000e-30 : f32
    %23 = vector.broadcast %cst_11 : f32 to vector<128x1xf32>
    %24 = arith.maximumf %22, %23 : vector<128x1xf32>
    %25 = tpu.reciprocal %24 : vector<128x1xf32> -> vector<128x1xf32>
    %26 = vector.broadcast %25 : vector<128x1xf32> to vector<128x128xf32>
    %27 = arith.mulf %20, %26 : vector<128x128xf32>
    %c0_12 = arith.constant 0 : index
    %c0_13 = arith.constant 0 : index
    %28 = vector.load %arg4[%c0_12, %c0_13] : memref<128x128xf32, #tpu.memory_space<vmem>>, vector<128x128xf32>
    tpu.vector_store %arg4[%c0_12, %c0_13], %27 {strides = array<i32>} : memref<128x128xf32, #tpu.memory_space<vmem>>, vector<128x128xf32>,
    return
  }
  func.func @transform_0(%arg0: i32) -> (i32, i32) {
    %c0_i32 = arith.constant 0 : i32
    %c0_i32_0 = arith.constant 0 : i32
    return %arg0, %c0_i32 : i32, i32
  }
  func.func @transform_1(%arg0: i32) -> (i32, i32) {
    %c0_i32 = arith.constant 0 : i32
    %c0_i32_0 = arith.constant 0 : i32
    %c0_i32_1 = arith.constant 0 : i32
    return %c0_i32, %c0_i32_0 : i32, i32
  }
  func.func @transform_2(%arg0: i32) -> (i32, i32) {
    %c0_i32 = arith.constant 0 : i32
    %c0_i32_0 = arith.constant 0 : i32
    return %arg0, %c0_i32 : i32, i32
  }
  func.func @transform_3(%arg0: i32) -> (i32, i32) {
    %c0_i32 = arith.constant 0 : i32
    %c0_i32_0 = arith.constant 0 : i32
    return %arg0, %c0_i32 : i32, i32
  }
  func.func @transform_4(%arg0: i32) -> (i32, i32) {
    %c0_i32 = arith.constant 0 : i32
    %c0_i32_0 = arith.constant 0 : i32
    return %arg0, %c0_i32 : i32, i32
  }
}

</mosaic_0001>

<bundles_post_ra>
// kernel: tpu_custom_call.1
= control target key start
LH: loop header
LB: loop body
LE: loop exit
PB: predicated region body
PF: predicated region fallthrough
CT: control target
= control target key end

     0   :  { %10 = vsyncpa [#allocation3], 0  ;;  %v885_v2 = vmov 0   ;;  %s1464_s0 = inlined_call_operand.vmem [shape: f32[128,1], index: 0, kind: input, shape index: {}]   ;;  %s1465_s1 = inlined_call_operand.vmem [shape: f32[1,128], index: 1, kind: input, shape index: {}]   ;;  %s1466_s2 = inlined_call_operand.vmem [shape: s8[128,128], index: 2, kind: input, shape index: {}]   ;;  %s1467_s3 = inlined_call_operand.hbm [shape: f32[128,128], index: 3, kind: output, shape index: {0}]   ;;  %s1468_s4 = inlined_call_operand.hbm [shape: f32[128,128], index: 4, kind: output, shape index: {1}]  }
   0x1   :  { %v22_v0 = vld [vmem:[%s1464_s0 + $0x10] sm:$0xff]  ;;  %v20_v1 = vld [vmem:[%s1464_s0] sm:$0xff]  ;;  %766 = vset.pattern.permute.xlu1 %v885_v2  ;;  %765 = vset.pattern.permute.xlu0 %v885_v2 }
   0x2   :  { %v24_v3 = vld [vmem:[%s1464_s0 + $0x20] sm:$0xff]  ;;  %49 = vperm.xlu1 %766, %v22_v0   ;;  %39 = vperm.xlu0 %765, %v20_v1  }
   0x3   :  { %767 = vset.pattern.permute.xlu2 %v885_v2 }
   0x4   :  { %59 = vperm.xlu2 %767, %v24_v3  }
   0x5   :  { %11 = vsyncpa [#allocation5], 0  ;;  %v23_v4 = vld [vmem:[%s1464_s0 + $0x18] sm:$0xff]  ;;  %v21_v5 = vld [vmem:[%s1464_s0 + $0x8] sm:$0xff]  ;;  %s743_s6 = sshll.u32 %s1468_s4, 4  ;;  %s887_s7 = smov 128   ;;  %s744_s6 = int_to_ptr.hbm [resolvable:$true] %s743_s6 }
   0x6   :  { %v25_v6 = vld [vmem:[%s1464_s0 + $0x28] sm:$0xff]  ;;  %v27_v7 = vld [vmem:[%s1464_s0 + $0x38] sm:$0xff]  ;;  %v26_v8 = vld [vmem:[%s1464_s0 + $0x30] sm:$0xff]  ;;  %s888_s8 = smov 8   ;;  %s889_s4 = smov [#allocation2]  }
   0x7   :  { %v28_v9 = vld [vmem:[%s1464_s0 + $0x40] sm:$0xff]  ;;  %v30_v10 = vld [vmem:[%s1464_s0 + $0x50] sm:$0xff]  ;;  %v29_v11 = vld [vmem:[%s1464_s0 + $0x48] sm:$0xff]  ;;  %s728_s9 = sshll.u32 %s889_s4, 4  ;;  %s730_s12 = sshll.u32 %s1467_s3, 4  ;;  %s729_s9 = int_to_ptr.vmem [resolvable:$true] %s728_s9  ;;  %s731_s12 = int_to_ptr.hbm [resolvable:$true] %s730_s12 }
   0x8   :  { %v31_v12 = vld [vmem:[%s1464_s0 + $0x58] sm:$0xff]  ;;  %v33_v13 = vld [vmem:[%s1464_s0 + $0x68] sm:$0xff]  ;;  %v32_v14 = vld [vmem:[%s1464_s0 + $0x60] sm:$0xff] }
   0x9   :  { %v34_v15 = vld [vmem:[%s1464_s0 + $0x70] sm:$0xff]  ;;  %v35_v16 = vld [vmem:[%s1464_s0 + $0x78] sm:$0xff]  ;;  %v184_v17 = vld [vmem:[%s1466_s2] sm:$0xff] }
   0xa   :  { %54 = vperm.xlu1 %766, %v23_v4   ;;  %44 = vperm.xlu0 %765, %v21_v5   ;;  %vm188_vm0 = vnez %v184_v17  ;;  %v972_v18 = vld [vmem:[%s1465_s1] ss:$0 sm:$0xff]  ;;  %v185_v20 = vld [vmem:[%s1466_s2 + $0x8] sm:$0xff]  ;;  %v186_v49 = vld [vmem:[%s1466_s2 + $0x10] sm:$0xff] }
   0xb   :  { %v192_v19 = vsel %vm188_vm0, 16843009, %v885_v2  ;;  %vm189_vm1 = vnez %v185_v20  ;;  %v187_v55 = vld [vmem:[%s1466_s2 + $0x18] sm:$0xff]  ;;  %vm190_vm6 = vnez %v186_v49  ;;  %s886_s2 = smov [#allocation4]  }
   0xc   :  { %64 = vperm.xlu2 %767, %v25_v6   ;;  %v198_v23 = vunpack.c.2.s8 %v192_v19  ;;  %v196_v24 = vunpack.c.0.s8 %v192_v19  ;;  %v982_v27 = vsel %vm189_vm1, 16843009, %v885_v2  ;;  %v197_v35 = vunpack.c.1.s8 %v192_v19  ;;  %s741_s29 = sshll.u32 %s886_s2, 4  ;;  %s742_s29 = int_to_ptr.vmem [resolvable:$true] %s741_s29 }
   0xd   :  { %v200_v31 = vunpack.c.0.s8 %v982_v27  ;;  %v199_v45 = vunpack.c.3.s8 %v192_v19  ;;  %v203_v48 = vunpack.c.3.s8 %v982_v27  ;;  %v202_v52 = vunpack.c.2.s8 %v982_v27 }
   0xe   :  { %v216_v28 = vpack.c.b16 %v198_v23, %v198_v23  ;;  %v212_v29 = vpack.c.b16 %v196_v24, %v196_v24  ;;  %v214_v39 = vpack.c.b16 %v197_v35, %v197_v35  ;;  %vm191_vm9 = vnez %v187_v55 }
   0xf   :  { %v220_v37 = vpack.c.b16 %v200_v31, %v200_v31  ;;  %v218_v54 = vpack.c.b16 %v199_v45, %v199_v45  ;;  %v226_v62 = vpack.c.b16 %v203_v48, %v203_v48  ;;  %v224_v3 = vpack.c.b16 %v202_v52, %v202_v52 }
  0x10   :  { %v217_v33 = vpack.c.b8 %v216_v28, %v216_v28  ;;  %v213_v34 = vpack.c.b8 %v212_v29, %v212_v29  ;;  %v215_v46 = vpack.c.b8 %v214_v39, %v214_v39  ;;  %v1050_v29 = vsel %vm191_vm9, 16843009, %v885_v2 }
  0x11   :  { %v221_v41 = vpack.c.b8 %v220_v37, %v220_v37  ;;  %v209_v52 = vunpack.c.1.s8 %v1050_v29 }
  0x12   :  { %74 = vperm.xlu1 %766, %v27_v7   ;;  %69 = vperm.xlu0 %765, %v26_v8   ;;  %vm246_vm2 = vnez %v217_v33  ;;  %vm244_vm3 = vnez %v213_v34  ;;  %vm1003_vm5 = vnez %v215_v46  ;;  %v219_v7 = vpack.c.b8 %v218_v54, %v218_v54 }
  0x13   :  { %v262_v43 = vsel %vm246_vm2, 16843009, %v885_v2  ;;  %v260_v44 = vsel %vm244_vm3, 16843009, %v885_v2  ;;  %vm248_vm4 = vnez %v221_v41  ;;  %v208_v54 = vunpack.c.0.s8 %v1050_v29 }
  0x14   :  { %79 = vperm.xlu2 %767, %v28_v9   ;;  %v278_v50 = vunpack.c.0.s8 %v262_v43  ;;  %v276_v51 = vunpack.c.0.s8 %v260_v44  ;;  %v264_v61 = vsel %vm248_vm4, 16843009, %v885_v2  ;;  %v261_v9 = vsel %vm1003_vm5, 16843009, %v885_v2 }
  0x15   :  { %v280_v8 = vunpack.c.0.s8 %v264_v61  ;;  %vm1044_vm10 = vnez %v219_v7 }
  0x16   :  { %vm1011_vm7 = vcmp.ne.s32.totalorder %v278_v50, 0  ;;  %vm1015_vm8 = vcmp.ne.s32.totalorder %v276_v51, 0  ;;  %v263_v41 = vsel %vm1044_vm10, 16843009, %v885_v2 }
  0x17   :  { %vm1055_vm11 = vcmp.ne.s32.totalorder %v280_v8, 0 }
  0x1a   :  { %89 = vperm.xlu1 %766, %v30_v10   ;;  %84 = vperm.xlu0 %765, %v29_v11   ;;  %v1025_v10 = vsel %vm190_vm6, 16843009, %v885_v2  ;;  %v201_v11 = vunpack.c.1.s8 %v982_v27  ;;  %v211_v27 = vunpack.c.3.s8 %v1050_v29 }
  0x1b   :  { %v206_v17 = vunpack.c.2.s8 %v1025_v10  ;;  %v205_v19 = vunpack.c.1.s8 %v1025_v10 }
  0x1c   :  { %94 = vperm.xlu2 %767, %v31_v12   ;;  %v222_v28 = vpack.c.b16 %v201_v11, %v201_v11 }
  0x1d   :  { %v232_v34 = vpack.c.b16 %v206_v17, %v206_v17  ;;  %v230_v35 = vpack.c.b16 %v205_v19, %v205_v19 }
  0x1e   :  { %v223_v45 = vpack.c.b8 %v222_v28, %v222_v28 }
  0x1f   :  { %v233_v50 = vpack.c.b8 %v232_v34, %v232_v34  ;;  %v231_v51 = vpack.c.b8 %v230_v35, %v230_v35 }
  0x20   :  { %vm249_vm15 = vnez %v223_v45 }
  0x21   :  { %vm254_vm0 = vnez %v233_v50  ;;  %vm253_vm1 = vnez %v231_v51 }
  0x22   :  { %104 = vperm.xlu1 %766, %v33_v13   ;;  %99 = vperm.xlu0 %765, %v32_v14  }
  0x24   :  { %109 = vperm.xlu2 %767, %v34_v15   ;;  %v227_v15 = vpack.c.b8 %v226_v62, %v226_v62 }
  0x26   :  { %vm251_vm12 = vnez %v227_v15  ;;  %v265_v15 = vsel %vm249_vm15, 16843009, %v885_v2 }
  0x27   :  { %v267_v44 = vsel %vm251_vm12, 16843009, %v885_v2 }
  0x28   :  { %v283_v61 = vunpack.c.0.s8 %v267_v44 }
  0x2a   :  { %114 = vperm.xlu0 %765, %v35_v16   ;;  %v225_v16 = vpack.c.b8 %v224_v3, %v224_v3  ;;  %vm1093_vm3 = vcmp.ne.s32.totalorder %v283_v61, 0 }
  0x2c   :  { %vm250_vm13 = vnez %v225_v16  ;;  %v207_v16 = vunpack.c.3.s8 %v1025_v10 }
  0x2d   :  { %v266_v49 = vsel %vm250_vm13, 16843009, %v885_v2 }
  0x2e   :  { %v282_v62 = vunpack.c.0.s8 %v266_v49 }
  0x30   :  { %vm1097_vm4 = vcmp.ne.s32.totalorder %v282_v62, 0 }
  0x5e   :  { %v60_v21 = vpop.permute.xlu2 %59 }
  0x5f   :  { %v124_v22 = vadd.f32 %v972_v18, %v60_v21 }
  0x61   :  { %v140_v25 = vmul.f32 0.2, %v124_v22 }
  0x63   :  { %v979_v26 = vmax.f32 %v124_v22, %v140_v25  ;;  %v277_v25 = vunpack.c.0.s8 %v261_v9 }
  0x65   :  { %172 = vst [vmem:[#allocation4 + $0x20] sm:$0xff] %v979_v26  ;;  %vm1067_vm14 = vcmp.ne.s32.totalorder %v277_v25, 0 }
  0x66   :  { %v65_v30 = vpop.permute.xlu2 %64 }
  0x67   :  { %v125_v32 = vadd.f32 %v972_v18, %v65_v30 }
  0x69   :  { %v141_v36 = vmul.f32 0.2, %v125_v32 }
  0x6b   :  { %v987_v38 = vmax.f32 %v125_v32, %v141_v36  ;;  %v204_v36 = vunpack.c.0.s8 %v1025_v10 }
  0x6d   :  { %173 = vst [vmem:[#allocation4 + $0x28] sm:$0xff] %v987_v38  ;;  %v228_v58 = vpack.c.b16 %v204_v36, %v204_v36 }
  0x6e   :  { %v80_v40 = vpop.permute.xlu2 %79 }
  0x6f   :  { %v128_v42 = vadd.f32 %v972_v18, %v80_v40  ;;  %v229_v9 = vpack.c.b8 %v228_v58, %v228_v58 }
  0x71   :  { %v144_v47 = vmul.f32 0.2, %v128_v42  ;;  %vm252_vm5 = vnez %v229_v9 }
  0x72   :  { %v268_v49 = vsel %vm252_vm5, 16843009, %v885_v2 }
  0x73   :  { %v998_v53 = vmax.f32 %v128_v42, %v144_v47  ;;  %v312_v42 = vsel %vm1055_vm11, %v979_v26, -9e+15  ;;  %v284_v62 = vunpack.c.0.s8 %v268_v49 }
  0x74   :  { %v50_v56 = vpop.permute.xlu1 %49  ;;  %v40_v57 = vpop.permute.xlu0 %39 }
  0x75   :  { %176 = vst [vmem:[#allocation4 + $0x40] sm:$0xff] %v998_v53  ;;  %v122_v59 = vadd.f32 %v972_v18, %v50_v56  ;;  %v120_v60 = vadd.f32 %v972_v18, %v40_v57  ;;  %v279_v57 = vunpack.c.0.s8 %v263_v41 }
  0x76   :  { %v95_v63 = vpop.permute.xlu2 %94 }
  0x77   :  { %v138_v4 = vmul.f32 0.2, %v122_v59  ;;  %v136_v5 = vmul.f32 0.2, %v120_v60  ;;  %v131_v6 = vadd.f32 %v972_v18, %v95_v63  ;;  %vm1089_vm2 = vcmp.ne.s32.totalorder %v279_v57, 0 }
  0x79   :  { %v1028_v12 = vmax.f32 %v122_v59, %v138_v4  ;;  %v1030_v13 = vmax.f32 %v120_v60, %v136_v5  ;;  %v147_v14 = vmul.f32 0.2, %v131_v6  ;;  %v238_v4 = vpack.c.b16 %v209_v52, %v209_v52 }
  0x7a   :  { %v236_v5 = vpack.c.b16 %v208_v54, %v208_v54 }
  0x7b   :  { %170 = vst [vmem:[#allocation4 + $0x10] sm:$0xff] %v1028_v12  ;;  %v1035_v20 = vmax.f32 %v131_v6, %v147_v14  ;;  %v310_v21 = vsel %vm1011_vm7, %v1028_v12, -9e+15  ;;  %v308_v22 = vsel %vm1015_vm8, %v1030_v13, -9e+15 }
  0x7c   :  { %168 = vst [vmem:[#allocation4] sm:$0xff] %v1030_v13  ;;  %v55_v23 = vpop.permute.xlu1 %54  ;;  %328 = vmax.xlane.f32.xlu0 %v310_v21  ;;  %324 = vmax.xlane.f32.xlu1 %v308_v22  ;;  %v45_v24 = vpop.permute.xlu0 %44  ;;  %v270_v21 = vsel %vm254_vm0, 16843009, %v885_v2  ;;  %v269_v22 = vsel %vm253_vm1, 16843009, %v885_v2  ;;  %v237_v25 = vpack.c.b8 %v236_v5, %v236_v5  ;;  %vm1156_vm1 = vcmp.ne.s32.totalorder %v284_v62, 0 }
  0x7d   :  { %179 = vst [vmem:[#allocation4 + $0x58] sm:$0xff] %v1035_v20  ;;  %v123_v30 = vadd.f32 %v972_v18, %v55_v23  ;;  %v121_v31 = vadd.f32 %v972_v18, %v45_v24  ;;  %v239_v24 = vpack.c.b8 %v238_v4, %v238_v4  ;;  %v286_v34 = vunpack.c.0.s8 %v270_v21 }
  0x7e   :  { %v110_v33 = vpop.permute.xlu2 %109  ;;  %v285_v35 = vunpack.c.0.s8 %v269_v22  ;;  %vm256_vm9 = vnez %v237_v25  ;;  %v1498_v22 = vmov 0 }
  0x7f   :  { %v139_v37 = vmul.f32 0.2, %v123_v30  ;;  %v137_v39 = vmul.f32 0.2, %v121_v31  ;;  %v134_v40 = vadd.f32 %v972_v18, %v110_v33  ;;  %vm257_vm6 = vnez %v239_v24 }
  0x80   :  { %vm1127_vm12 = vcmp.ne.s32.totalorder %v286_v34, 0  ;;  %vm1131_vm13 = vcmp.ne.s32.totalorder %v285_v35, 0  ;;  %v273_v52 = vsel %vm257_vm6, 16843009, %v885_v2  ;;  %v272_v54 = vsel %vm256_vm9, 16843009, %v885_v2 }
  0x81   :  { %v1072_v46 = vmax.f32 %v123_v30, %v139_v37  ;;  %v1074_v47 = vmax.f32 %v121_v31, %v137_v39  ;;  %v150_v48 = vmul.f32 0.2, %v134_v40  ;;  %v281_v30 = vunpack.c.0.s8 %v265_v15 }
  0x82   :  { %v234_v39 = vpack.c.b16 %v207_v16, %v207_v16  ;;  %v289_v4 = vunpack.c.0.s8 %v273_v52  ;;  %v288_v5 = vunpack.c.0.s8 %v272_v54 }
  0x83   :  { %171 = vst [vmem:[#allocation4 + $0x18] sm:$0xff] %v1072_v46  ;;  %v1080_v55 = vmax.f32 %v134_v40, %v150_v48  ;;  %v309_v56 = vsel %vm1067_vm14, %v1074_v47, -9e+15  ;;  %v311_v23 = vsel %vm1089_vm2, %v1072_v46, -9e+15  ;;  %v242_v40 = vpack.c.b16 %v211_v27, %v211_v27 }
  0x84   :  { %169 = vst [vmem:[#allocation4 + $0x8] sm:$0xff] %v1074_v47  ;;  %v75_v59 = vpop.permute.xlu1 %74  ;;  %332 = vmax.xlane.f32.xlu1 %v312_v42  ;;  %326 = vmax.xlane.f32.xlu2 %v309_v56  ;;  %v70_v60 = vpop.permute.xlu0 %69  ;;  %vm1123_vm10 = vcmp.ne.s32.totalorder %v281_v30, 0  ;;  %v235_v57 = vpack.c.b8 %v234_v39, %v234_v39  ;;  %vm1160_vm5 = vcmp.ne.s32.totalorder %v289_v4, 0  ;;  %vm1164_vm6 = vcmp.ne.s32.totalorder %v288_v5, 0 }
  0x85   :  { %182 = vst [vmem:[#allocation4 + $0x70] sm:$0xff] %v1080_v55  ;;  %v127_v63 = vadd.f32 %v972_v18, %v75_v59  ;;  %v126_v3 = vadd.f32 %v972_v18, %v70_v60  ;;  %v313_v56 = vsel %vm1123_vm10, %v987_v38, -9e+15  ;;  %v243_v58 = vpack.c.b8 %v242_v40, %v242_v40 }
  0x86   :  { %v210_v59 = vunpack.c.2.s8 %v1050_v29  ;;  %vm255_vm15 = vnez %v235_v57  ;;  %v1499_v22 = vsel %vm1164_vm6, 4294967295, %v1498_v22 }
  0x87   :  { %v143_v6 = vmul.f32 0.2, %v127_v63  ;;  %v142_v7 = vmul.f32 0.2, %v126_v3  ;;  %vm259_vm0 = vnez %v243_v58  ;;  %v271_v25 = vsel %vm255_vm15, 16843009, %v885_v2 }
  0x88   :  { %v275_v27 = vsel %vm259_vm0, 16843009, %v885_v2  ;;  %v287_v34 = vunpack.c.0.s8 %v271_v25 }
  0x89   :  { %v1103_v17 = vmax.f32 %v127_v63, %v143_v6  ;;  %v1105_v19 = vmax.f32 %v126_v3, %v142_v7  ;;  %v240_v7 = vpack.c.b16 %v210_v59, %v210_v59  ;;  %v291_v35 = vunpack.c.0.s8 %v275_v27 }
  0x8a   :  { %vm1186_vm15 = vcmp.ne.s32.totalorder %v287_v34, 0 }
  0x8b   :  { %175 = vst [vmem:[#allocation4 + $0x38] sm:$0xff] %v1103_v17  ;;  %v315_v10 = vsel %vm1093_vm3, %v1103_v17, -9e+15  ;;  %v314_v28 = vsel %vm1097_vm4, %v1105_v19, -9e+15  ;;  %vm1190_vm0 = vcmp.ne.s32.totalorder %v291_v35, 0 }
  0x8c   :  { %174 = vst [vmem:[#allocation4 + $0x30] sm:$0xff] %v1105_v19  ;;  %v90_v31 = vpop.permute.xlu1 %89  ;;  %338 = vmax.xlane.f32.xlu1 %v315_v10  ;;  %330 = vmax.xlane.f32.xlu2 %v311_v23  ;;  %v85_v33 = vpop.permute.xlu0 %84  ;;  %v316_v10 = vsel %vm1156_vm1, %v998_v53, -9e+15 }
  0x8d   :  { %v130_v36 = vadd.f32 %v972_v18, %v90_v31  ;;  %336 = vmax.xlane.f32.xlu0 %v314_v28  ;;  %v129_v37 = vadd.f32 %v972_v18, %v85_v33  ;;  %v241_v28 = vpack.c.b8 %v240_v7, %v240_v7 }
  0x8f   :  { %v146_v41 = vmul.f32 0.2, %v130_v36  ;;  %v145_v42 = vmul.f32 0.2, %v129_v37  ;;  %vm258_vm9 = vnez %v241_v28 }
  0x91   :  { %v1136_v50 = vmax.f32 %v130_v36, %v146_v41  ;;  %v1138_v51 = vmax.f32 %v129_v37, %v145_v42  ;;  %v274_v42 = vsel %vm258_vm9, 16843009, %v885_v2 }
  0x92   :  { %v290_v52 = vunpack.c.0.s8 %v274_v42 }
  0x93   :  { %178 = vst [vmem:[#allocation4 + $0x50] sm:$0xff] %v1136_v50  ;;  %v318_v60 = vsel %vm1127_vm12, %v1136_v50, -9e+15  ;;  %v317_v61 = vsel %vm1131_vm13, %v1138_v51, -9e+15 }
  0x94   :  { %177 = vst [vmem:[#allocation4 + $0x48] sm:$0xff] %v1138_v51  ;;  %v105_v63 = vpop.permute.xlu1 %104  ;;  %344 = vmax.xlane.f32.xlu1 %v318_v60  ;;  %334 = vmax.xlane.f32.xlu2 %v313_v56  ;;  %v100_v3 = vpop.permute.xlu0 %99 }
  0x95   :  { %v133_v29 = vadd.f32 %v972_v18, %v105_v63  ;;  %342 = vmax.xlane.f32.xlu0 %v317_v61  ;;  %v132_v6 = vadd.f32 %v972_v18, %v100_v3 }
  0x97   :  { %v149_v9 = vmul.f32 0.2, %v133_v29  ;;  %v148_v15 = vmul.f32 0.2, %v132_v6 }
  0x99   :  { %v1168_v23 = vmax.f32 %v133_v29, %v149_v9  ;;  %v1170_v24 = vmax.f32 %v132_v6, %v148_v15 }
  0x9b   :  { %181 = vst [vmem:[#allocation4 + $0x68] sm:$0xff] %v1168_v23  ;;  %v321_v30 = vsel %vm1160_vm5, %v1168_v23, -9e+15  ;;  %v320_v31 = vsel %vm1164_vm6, %v1170_v24, -9e+15  ;;  %vm1204_vm6 = vcmp.ne.s32.totalorder %v290_v52, 0 }
  0x9c   :  { %180 = vst [vmem:[#allocation4 + $0x60] sm:$0xff] %v1170_v24  ;;  %350 = vmax.xlane.f32.xlu1 %v321_v30  ;;  %340 = vmax.xlane.f32.xlu2 %v316_v10  ;;  %v115_v33 = vpop.permute.xlu0 %114  ;;  %v322_v2 = vsel %vm1204_vm6, %v1080_v55, -9e+15 }
  0x9d   :  { %348 = vmax.xlane.f32.xlu0 %v320_v31  ;;  %v135_v36 = vadd.f32 %v972_v18, %v115_v33  ;;  %v319_v18 = vsel %vm1186_vm15, %v1035_v20, -9e+15 }
  0x9f   :  { %v151_v37 = vmul.f32 0.2, %v135_v36 }
  0xa1   :  { %v1194_v41 = vmax.f32 %v135_v36, %v151_v37 }
  0xa3   :  { %183 = vst [vmem:[#allocation4 + $0x78] sm:$0xff] %v1194_v41  ;;  %v323_v49 = vsel %vm1190_vm0, %v1194_v41, -9e+15 }
  0xa4   :  { %346 = vmax.xlane.f32.xlu2 %v319_v18  ;;  %749 = dma.vmem_to_hbm [thread:$0]  %s742_s29, 2048, %s744_s6, [#allocation5], %s887_s7, %s887_s7, %s888_s8  }
  0xa5   :  { %354 = vmax.xlane.f32.xlu0 %v323_v49 }
  0xac   :  { %352 = vmax.xlane.f32.xlu2 %v322_v2 }
  0xef   :  { %v325_v56 = vpop.xlane.xlu1 %324  ;;  %v329_v57 = vpop.xlane.xlu0 %328 }
  0xf0   :  { %v356_v58 = vsub.f32 %v1030_v13, %v325_v56  ;;  %v358_v59 = vsub.f32 %v1028_v12, %v329_v57 }
  0xf2   :  { %v372_v60 = vmul.f32 1.442695, %v356_v58  ;;  %v376_v61 = vmul.f32 1.442695, %v358_v59 }
  0xf4   :  { %769 = vpow2.f32 %v372_v60 }
  0xf5   :  { %771 = vpow2.f32 %v376_v61 }
  0xf7   :  { %v333_v62 = vpop.xlane.xlu1 %332  ;;  %v327_v63 = vpop.xlane.xlu2 %326 }
  0xf8   :  { %v357_v3 = vsub.f32 %v1074_v47, %v327_v63  ;;  %v360_v6 = vsub.f32 %v979_v26, %v333_v62 }
  0xfa   :  { %v770_v4 = vpop.eup %769  ;;  %v374_v5 = vmul.f32 1.442695, %v357_v3  ;;  %v380_v13 = vmul.f32 1.442695, %v360_v6 }
  0xfb   :  { %v772_v29 = vpop.eup %771  ;;  %v1217_v7 = vsel %vm1015_vm8, %v770_v4, 0.0 }
  0xfc   :  { %420 = vadd.xlane.f32.xlu1 %v1217_v7  ;;  %v1222_v12 = vsel %vm1011_vm7, %v772_v29, 0.0  ;;  %773 = vpow2.f32 %v374_v5  ;;  %vm1506_vm7 = vnez %v1499_v22 }
  0xfd   :  { %424 = vadd.xlane.f32.xlu0 %v1222_v12  ;;  %775 = vpow2.f32 %v380_v13 }
  0xff   :  { %v339_v47 = vpop.xlane.xlu1 %338  ;;  %v331_v9 = vpop.xlane.xlu2 %330 }
 0x100   :  { %v359_v15 = vsub.f32 %v1072_v46, %v331_v9  ;;  %v337_v25 = vpop.xlane.xlu0 %336  ;;  %v363_v1 = vsub.f32 %v1103_v17, %v339_v47 }
 0x101   :  { %v362_v10 = vsub.f32 %v1105_v19, %v337_v25 }
 0x102   :  { %v378_v26 = vmul.f32 1.442695, %v359_v15  ;;  %v774_v27 = vpop.eup %773  ;;  %v386_v28 = vmul.f32 1.442695, %v363_v1 }
 0x103   :  { %v1230_v0 = vsel %vm1067_vm14, %v774_v27, 0.0  ;;  %v384_v33 = vmul.f32 1.442695, %v362_v10  ;;  %v776_v35 = vpop.eup %775 }
 0x104   :  { %777 = vpow2.f32 %v378_v26  ;;  %422 = vadd.xlane.f32.xlu2 %v1230_v0  ;;  %v1238_v19 = vsel %vm1055_vm11, %v776_v35, 0.0 }
 0x105   :  { %779 = vpow2.f32 %v386_v28 }
 0x106   :  { %781 = vpow2.f32 %v384_v33 }
 0x107   :  { %v345_v30 = vpop.xlane.xlu1 %344  ;;  %v335_v31 = vpop.xlane.xlu2 %334 }
 0x108   :  { %v361_v46 = vsub.f32 %v987_v38, %v335_v31  ;;  %v343_v34 = vpop.xlane.xlu0 %342  ;;  %v366_v17 = vsub.f32 %v1136_v50, %v345_v30 }
 0x109   :  { %v365_v43 = vsub.f32 %v1138_v51, %v343_v34 }
 0x10a   :  { %v382_v36 = vmul.f32 1.442695, %v361_v46  ;;  %v778_v37 = vpop.eup %777  ;;  %v392_v38 = vmul.f32 1.442695, %v366_v17 }
 0x10b   :  { %v1242_v42 = vsel %vm1089_vm2, %v778_v37, 0.0  ;;  %v390_v50 = vmul.f32 1.442695, %v365_v43  ;;  %v780_v2 = vpop.eup %779 }
 0x10c   :  { %783 = vpow2.f32 %v382_v36  ;;  %428 = vadd.xlane.f32.xlu2 %v1238_v19  ;;  %426 = vadd.xlane.f32.xlu1 %v1242_v42  ;;  %v782_v32 = vpop.eup %781  ;;  %v1251_v59 = vsel %vm1093_vm3, %v780_v2, 0.0 }
 0x10d   :  { %785 = vpow2.f32 %v392_v38 }
 0x10e   :  { %787 = vpow2.f32 %v390_v50 }
 0x10f   :  { %v351_v18 = vpop.xlane.xlu1 %350  ;;  %v341_v49 = vpop.xlane.xlu2 %340 }
 0x110   :  { %v364_v52 = vsub.f32 %v998_v53, %v341_v49  ;;  %v349_v51 = vpop.xlane.xlu0 %348  ;;  %v369_v56 = vsub.f32 %v1168_v23, %v351_v18  ;;  %v1261_v53 = vsel %vm1097_vm4, %v782_v32, 0.0 }
 0x111   :  { %v368_v58 = vsub.f32 %v1170_v24, %v349_v51 }
 0x112   :  { %v388_v57 = vmul.f32 1.442695, %v364_v52  ;;  %v784_v8 = vpop.eup %783  ;;  %v398_v23 = vmul.f32 1.442695, %v369_v56 }
 0x113   :  { %v1255_v60 = vsel %vm1123_vm10, %v784_v8, 0.0  ;;  %v396_v24 = vmul.f32 1.442695, %v368_v58  ;;  %v786_v44 = vpop.eup %785 }
 0x114   :  { %789 = vpow2.f32 %v388_v57  ;;  %434 = vadd.xlane.f32.xlu2 %v1251_v59  ;;  %430 = vadd.xlane.f32.xlu0 %v1255_v60  ;;  %v788_v63 = vpop.eup %787  ;;  %v1268_v14 = vsel %vm1127_vm12, %v786_v44, 0.0 }
 0x115   :  { %432 = vadd.xlane.f32.xlu1 %v1261_v53  ;;  %791 = vpow2.f32 %v398_v23 }
 0x116   :  { %793 = vpow2.f32 %v396_v24 }
 0x117   :  { %v347_v11 = vpop.xlane.xlu2 %346 }
 0x118   :  { %v367_v61 = vsub.f32 %v1035_v20, %v347_v11  ;;  %v355_v62 = vpop.xlane.xlu0 %354  ;;  %v1278_v20 = vsel %vm1131_vm13, %v788_v63, 0.0 }
 0x119   :  { %v371_v5 = vsub.f32 %v1194_v41, %v355_v62 }
 0x11a   :  { %v394_v3 = vmul.f32 1.442695, %v367_v61  ;;  %v790_v4 = vpop.eup %789 }
 0x11b   :  { %v1272_v29 = vsel %vm1156_vm1, %v790_v4, 0.0  ;;  %v402_v41 = vmul.f32 1.442695, %v371_v5  ;;  %v792_v13 = vpop.eup %791 }
 0x11c   :  { %795 = vpow2.f32 %v394_v3  ;;  %440 = vadd.xlane.f32.xlu2 %v1268_v14  ;;  %436 = vadd.xlane.f32.xlu0 %v1272_v29  ;;  %v794_v47 = vpop.eup %793  ;;  %v1288_v48 = vsel %vm1160_vm5, %v792_v13, 0.0 }
 0x11d   :  { %438 = vadd.xlane.f32.xlu1 %v1278_v20  ;;  %797 = vpow2.f32 %v402_v41 }
 0x11f   :  { %v353_v6 = vpop.xlane.xlu2 %352 }
 0x120   :  { %v370_v45 = vsub.f32 %v1080_v55, %v353_v6  ;;  %v1294_v55 = vsel %vm1506_vm7, %v794_v47, 0.0 }
 0x122   :  { %v796_v9 = vpop.eup %795  ;;  %v400_v16 = vmul.f32 1.442695, %v370_v45 }
 0x123   :  { %v1284_v15 = vsel %vm1186_vm15, %v796_v9, 0.0  ;;  %v798_v25 = vpop.eup %797 }
 0x124   :  { %799 = vpow2.f32 %v400_v16  ;;  %446 = vadd.xlane.f32.xlu2 %v1288_v48  ;;  %442 = vadd.xlane.f32.xlu0 %v1284_v15  ;;  %v1304_v21 = vsel %vm1190_vm0, %v798_v25, 0.0 }
 0x125   :  { %444 = vadd.xlane.f32.xlu1 %v1294_v55 }
 0x12a   :  { %v800_v26 = vpop.eup %799 }
 0x12b   :  { %v1299_v39 = vsel %vm1204_vm6, %v800_v26, 0.0 }
 0x12c   :  { %448 = vadd.xlane.f32.xlu0 %v1299_v39 }
 0x12d   :  { %450 = vadd.xlane.f32.xlu1 %v1304_v21 }
 0x16f   :  { %v421_v22 = vpop.xlane.xlu1 %420 }
 0x170   :  { %v452_v40 = vmax.f32 %v421_v22, 1e-30  ;;  %v425_v54 = vpop.xlane.xlu0 %424 }
 0x171   :  { %v454_v27 = vmax.f32 %v425_v54, 1e-30 }
 0x172   :  { %801 = vrcp.f32 %v452_v40  ;;  %v477_v34 = vand.u32 2147483647, %v452_v40  ;;  %v479_v35 = vand.u32 2147483648, %v452_v40  ;;  %vm473_vm14 = vweird.f32 %v452_v40 }
 0x173   :  { %803 = vrcp.f32 %v454_v27  ;;  %v507_v17 = vand.u32 2147483648, %v454_v27  ;;  %v505_v38 = vand.u32 2147483647, %v454_v27  ;;  %vm501_vm4 = vweird.f32 %v454_v27 }
 0x174   :  { %vm478_vm3 = vcmp.eq.f32.partialorder %v477_v34, 8.507059e+37  ;;  %v480_v49 = vor.u32 1.1754944e-38, %v479_v35 }
 0x175   :  { %v508_v56 = vor.u32 1.1754944e-38, %v507_v17  ;;  %vm506_vm12 = vcmp.eq.f32.partialorder %v505_v38, 8.507059e+37 }
 0x177   :  { %v423_v10 = vpop.xlane.xlu2 %422 }
 0x178   :  { %v802_v1 = vpop.eup %801  ;;  %v453_v31 = vmax.f32 %v423_v10, 1e-30 }
 0x179   :  { %v804_v28 = vpop.eup %803  ;;  %v469_v30 = vmul.f32 %v802_v1, %v452_v40  ;;  %vm474_vm8 = vweird.f32 %v802_v1 }
 0x17a   :  { %v497_v33 = vmul.f32 %v804_v28, %v454_v27  ;;  %805 = vrcp.f32 %v453_v31  ;;  %vm502_vm11 = vweird.f32 %v804_v28  ;;  %vm475_vm2 = vmor %vm473_vm14, %vm474_vm8  ;;  %v491_v63 = vand.u32 2147483647, %v453_v31 }
 0x17b   :  { %v470_v46 = vsub.f32 1.0, %v469_v30  ;;  %vm503_vm10 = vmor %vm501_vm4, %vm502_vm11  ;;  %v493_v3 = vand.u32 2147483648, %v453_v31  ;;  %vm487_vm1 = vweird.f32 %v453_v31 }
 0x17c   :  { %v498_v36 = vsub.f32 1.0, %v497_v33  ;;  %vm492_vm6 = vcmp.eq.f32.partialorder %v491_v63, 8.507059e+37 }
 0x17d   :  { %v471_v37 = vmul.f32 %v802_v1, %v470_v46 }
 0x17e   :  { %v499_v43 = vmul.f32 %v804_v28, %v498_v36 }
 0x17f   :  { %v472_v18 = vadd.f32 %v802_v1, %v471_v37  ;;  %v427_v52 = vpop.xlane.xlu1 %426  ;;  %v429_v51 = vpop.xlane.xlu2 %428 }
 0x180   :  { %v500_v50 = vadd.f32 %v804_v28, %v499_v43  ;;  %v806_v2 = vpop.eup %805  ;;  %v455_v57 = vmax.f32 %v427_v52, 1e-30  ;;  %v1313_v8 = vmax.f32 %v429_v51, 1e-30 }
 0x181   :  { %v476_v32 = vsel %vm475_vm2, %v802_v1, %v472_v18  ;;  %v483_v24 = vmul.f32 %v806_v2, %v453_v31  ;;  %vm488_vm13 = vweird.f32 %v806_v2 }
 0x182   :  { %v481_v58 = vsel %vm478_vm3, %v480_v49, %v476_v32  ;;  %v504_v23 = vsel %vm503_vm10, %v804_v28, %v500_v50  ;;  %807 = vrcp.f32 %v455_v57  ;;  %vm489_vm5 = vmor %vm487_vm1, %vm488_vm13  ;;  %v519_v16 = vand.u32 2147483647, %v455_v57 }
 0x183   :  { %v692_v11 = vmul.f32 %v481_v58, %v1217_v7  ;;  %v509_v61 = vsel %vm506_vm12, %v508_v56, %v504_v23  ;;  %v484_v44 = vsub.f32 1.0, %v483_v24  ;;  %809 = vrcp.f32 %v1313_v8 }
 0x184   :  { %v694_v62 = vmul.f32 %v509_v61, %v1222_v12  ;;  %v494_v7 = vor.u32 1.1754944e-38, %v493_v3  ;;  %v521_v40 = vand.u32 2147483648, %v455_v57  ;;  %v533_v28 = vand.u32 2147483647, %v1313_v8 }
 0x185   :  { %708 = vst [vmem:[#allocation2] sm:$0xff] %v692_v11  ;;  %v485_v4 = vmul.f32 %v806_v2, %v484_v44  ;;  %vm515_vm9 = vweird.f32 %v455_v57  ;;  %v535_v30 = vand.u32 2147483648, %v1313_v8  ;;  %vm1331_vm0 = vcmp.eq.f32.partialorder %v519_v16, 8.507059e+37 }
 0x186   :  { %710 = vst [vmem:[#allocation2 + $0x10] sm:$0xff] %v694_v62  ;;  %vm529_vm7 = vweird.f32 %v1313_v8  ;;  %vm1337_vm11 = vcmp.eq.f32.partialorder %v533_v28, 8.507059e+37 }
 0x187   :  { %v486_v5 = vadd.f32 %v806_v2, %v485_v4  ;;  %v435_v41 = vpop.xlane.xlu2 %434  ;;  %v431_v6 = vpop.xlane.xlu0 %430  ;;  %v536_v18 = vor.u32 1.1754944e-38, %v535_v30 }
 0x188   :  { %v808_v13 = vpop.eup %807  ;;  %v1318_v45 = vmax.f32 %v435_v41, 1e-30  ;;  %v433_v12 = vpop.xlane.xlu1 %432  ;;  %v1323_v54 = vmax.f32 %v431_v6, 1e-30 }
 0x189   :  { %v490_v47 = vsel %vm489_vm5, %v806_v2, %v486_v5  ;;  %v511_v9 = vmul.f32 %v808_v13, %v455_v57  ;;  %v1320_v25 = vmax.f32 %v433_v12, 1e-30  ;;  %v810_v26 = vpop.eup %809  ;;  %vm516_vm15 = vweird.f32 %v808_v13 }
 0x18a   :  { %v495_v22 = vsel %vm492_vm6, %v494_v7, %v490_v47  ;;  %811 = vrcp.f32 %v1318_v45  ;;  %v525_v10 = vmul.f32 %v810_v26, %v1313_v8  ;;  %v575_v46 = vand.u32 2147483647, %v1318_v45  ;;  %vm517_vm14 = vmor %vm515_vm9, %vm516_vm15 }
 0x18b   :  { %v693_v27 = vmul.f32 %v495_v22, %v1230_v0  ;;  %v512_v1 = vsub.f32 1.0, %v511_v9  ;;  %813 = vrcp.f32 %v1320_v25  ;;  %v522_v0 = vor.u32 1.1754944e-38, %v521_v40 }
 0x18c   :  { %v526_v33 = vsub.f32 1.0, %v525_v10  ;;  %815 = vrcp.f32 %v1323_v54  ;;  %vm530_vm8 = vweird.f32 %v810_v26  ;;  %vm571_vm2 = vweird.f32 %v1318_v45 }
 0x18d   :  { %709 = vst [vmem:[#allocation2 + $0x8] sm:$0xff] %v693_v27  ;;  %v513_v31 = vmul.f32 %v808_v13, %v512_v1  ;;  %v577_v49 = vand.u32 2147483648, %v1318_v45  ;;  %vm1347_vm3 = vcmp.eq.f32.partialorder %v575_v46, 8.507059e+37  ;;  %vm557_vm4 = vweird.f32 %v1320_v25  ;;  %vm531_vm10 = vmor %vm529_vm7, %vm530_vm8 }
 0x18e   :  { %v527_v36 = vmul.f32 %v810_v26, %v526_v33  ;;  %v561_v58 = vand.u32 2147483647, %v1320_v25  ;;  %v563_v4 = vand.u32 2147483648, %v1320_v25  ;;  %vm543_vm1 = vweird.f32 %v1323_v54 }
 0x18f   :  { %v514_v35 = vadd.f32 %v808_v13, %v513_v31  ;;  %v441_v17 = vpop.xlane.xlu2 %440  ;;  %v437_v43 = vpop.xlane.xlu0 %436  ;;  %v578_v8 = vor.u32 1.1754944e-38, %v577_v49 }
 0x190   :  { %v812_v38 = vpop.eup %811  ;;  %v1344_v50 = vmax.f32 %v441_v17, 1e-30  ;;  %v528_v51 = vadd.f32 %v810_v26, %v527_v36  ;;  %v439_v23 = vpop.xlane.xlu1 %438  ;;  %v1359_v24 = vmax.f32 %v437_v43, 1e-30  ;;  %vm1376_vm6 = vcmp.eq.f32.partialorder %v561_v58, 8.507059e+37 }
 0x191   :  { %v518_v52 = vsel %vm517_vm14, %v808_v13, %v514_v35  ;;  %v567_v2 = vmul.f32 %v812_v38, %v1318_v45  ;;  %v814_v56 = vpop.eup %813  ;;  %vm572_vm12 = vweird.f32 %v812_v38  ;;  %v1370_v7 = vmax.f32 %v439_v23, 1e-30 }
 0x192   :  { %v523_v57 = vsel %vm1331_vm0, %v522_v0, %v518_v52  ;;  %817 = vrcp.f32 %v1344_v50  ;;  %v532_v61 = vsel %vm531_vm10, %v810_v26, %v528_v51  ;;  %v553_v44 = vmul.f32 %v814_v56, %v1320_v25  ;;  %v816_v63 = vpop.eup %815  ;;  %vm573_vm5 = vmor %vm571_vm2, %vm572_vm12 }
 0x193   :  { %v695_v11 = vmul.f32 %v523_v57, %v1242_v42  ;;  %v568_v62 = vsub.f32 1.0, %v567_v2  ;;  %v537_v3 = vsel %vm1337_vm11, %v536_v18, %v532_v61  ;;  %v539_v13 = vmul.f32 %v816_v63, %v1323_v54 }
 0x194   :  { %v696_v5 = vmul.f32 %v537_v3, %v1238_v19  ;;  %v554_v6 = vsub.f32 1.0, %v553_v44  ;;  %vm558_vm13 = vweird.f32 %v814_v56  ;;  %v547_v42 = vand.u32 2147483647, %v1323_v54 }
 0x195   :  { %711 = vst [vmem:[#allocation2 + $0x18] sm:$0xff] %v695_v11  ;;  %v569_v41 = vmul.f32 %v812_v38, %v568_v62  ;;  %v540_v9 = vsub.f32 1.0, %v539_v13  ;;  %819 = vrcp.f32 %v1359_v24  ;;  %vm544_vm9 = vweird.f32 %v816_v63  ;;  %vm559_vm15 = vmor %vm557_vm4, %vm558_vm13 }
 0x196   :  { %712 = vst [vmem:[#allocation2 + $0x20] sm:$0xff] %v696_v5  ;;  %v555_v47 = vmul.f32 %v814_v56, %v554_v6  ;;  %v549_v26 = vand.u32 2147483648, %v1323_v54  ;;  %821 = vrcp.f32 %v1370_v7  ;;  %v564_v45 = vor.u32 1.1754944e-38, %v563_v4  ;;  %vm545_vm0 = vmor %vm543_vm1, %vm544_vm9 }
 0x197   :  { %v570_v12 = vadd.f32 %v812_v38, %v569_v41  ;;  %v541_v27 = vmul.f32 %v816_v63, %v540_v9  ;;  %v617_v28 = vand.u32 2147483647, %v1344_v50  ;;  %v619_v30 = vand.u32 2147483648, %v1344_v50  ;;  %v447_v31 = vpop.xlane.xlu2 %446  ;;  %v443_v18 = vpop.xlane.xlu0 %442 }
 0x198   :  { %v818_v16 = vpop.eup %817  ;;  %v556_v40 = vadd.f32 %v814_v56, %v555_v47  ;;  %vm548_vm7 = vcmp.eq.f32.partialorder %v547_v42, 8.507059e+37  ;;  %v550_v25 = vor.u32 1.1754944e-38, %v549_v26  ;;  %v445_v36 = vpop.xlane.xlu1 %444  ;;  %vm613_vm11 = vweird.f32 %v1344_v50 }
 0x199   :  { %v574_v22 = vsel %vm573_vm5, %v812_v38, %v570_v12  ;;  %v609_v1 = vmul.f32 %v818_v16, %v1344_v50  ;;  %v542_v34 = vadd.f32 %v816_v63, %v541_v27  ;;  %vm614_vm8 = vweird.f32 %v818_v16 }
 0x19a   :  { %v579_v10 = vsel %vm1347_vm3, %v578_v8, %v574_v22  ;;  %v560_v46 = vsel %vm559_vm15, %v814_v56, %v556_v40  ;;  %v1397_v38 = vmax.f32 %v447_v31, 1e-30  ;;  %vm1400_vm14 = vcmp.eq.f32.partialorder %v617_v28, 8.507059e+37  ;;  %vm615_vm2 = vmor %vm613_vm11, %vm614_vm8 }
 0x19b   :  { %v699_v33 = vmul.f32 %v579_v10, %v1251_v59  ;;  %v610_v0 = vsub.f32 1.0, %v609_v1  ;;  %v565_v35 = vsel %vm1376_vm6, %v564_v45, %v560_v46  ;;  %v820_v37 = vpop.eup %819  ;;  %v546_v43 = vsel %vm545_vm0, %v816_v63, %v542_v34 }
 0x19c   :  { %v698_v17 = vmul.f32 %v565_v35, %v1261_v53  ;;  %v822_v49 = vpop.eup %821  ;;  %v551_v52 = vsel %vm548_vm7, %v550_v25, %v546_v43  ;;  %v581_v51 = vmul.f32 %v820_v37, %v1359_v24  ;;  %v620_v53 = vor.u32 1.1754944e-38, %v619_v30 }
 0x19d   :  { %715 = vst [vmem:[#allocation2 + $0x38] sm:$0xff] %v699_v33  ;;  %v611_v59 = vmul.f32 %v818_v16, %v610_v0  ;;  %v697_v2 = vmul.f32 %v551_v52, %v1255_v60  ;;  %v595_v56 = vmul.f32 %v822_v49, %v1370_v7  ;;  %v605_v57 = vand.u32 2147483648, %v1370_v7 }
 0x19e   :  { %714 = vst [vmem:[#allocation2 + $0x30] sm:$0xff] %v698_v17  ;;  %v582_v58 = vsub.f32 1.0, %v581_v51  ;;  %v589_v50 = vand.u32 2147483647, %v1359_v24  ;;  %823 = vrcp.f32 %v1397_v38  ;;  %vm586_vm3 = vweird.f32 %v820_v37 }
 0x19f   :  { %v612_v32 = vadd.f32 %v818_v16, %v611_v59  ;;  %713 = vst [vmem:[#allocation2 + $0x28] sm:$0xff] %v697_v2  ;;  %v596_v11 = vsub.f32 1.0, %v595_v56  ;;  %v591_v61 = vand.u32 2147483648, %v1359_v24  ;;  %v1414_v44 = vmax.f32 %v445_v36, 1e-30 }
 0x1a0   :  { %v583_v62 = vmul.f32 %v820_v37, %v582_v58  ;;  %v1416_v63 = vmax.f32 %v443_v18, 1e-30  ;;  %vm600_vm4 = vweird.f32 %v822_v49  ;;  %v603_v4 = vand.u32 2147483647, %v1370_v7  ;;  %v451_v12 = vpop.xlane.xlu1 %450 }
 0x1a1   :  { %v616_v23 = vsel %vm615_vm2, %v818_v16, %v612_v32  ;;  %v597_v8 = vmul.f32 %v822_v49, %v596_v11  ;;  %vm585_vm10 = vweird.f32 %v1359_v24  ;;  %825 = vrcp.f32 %v1414_v44  ;;  %v449_v16 = vpop.xlane.xlu0 %448 }
 0x1a2   :  { %v621_v60 = vsel %vm1400_vm14, %v620_v53, %v616_v23  ;;  %v584_v5 = vadd.f32 %v820_v37, %v583_v62  ;;  %vm599_vm12 = vweird.f32 %v1370_v7  ;;  %vm587_vm13 = vmor %vm585_vm10, %vm586_vm3  ;;  %v592_v6 = vor.u32 1.1754944e-38, %v591_v61 }
 0x1a3   :  { %v702_v3 = vmul.f32 %v621_v60, %v1268_v14  ;;  %v598_v41 = vadd.f32 %v822_v49, %v597_v8  ;;  %827 = vrcp.f32 %v1416_v63  ;;  %vm601_vm1 = vmor %vm599_vm12, %vm600_vm4  ;;  %v606_v14 = vor.u32 1.1754944e-38, %v605_v57 }
 0x1a4   :  { %v824_v13 = vpop.eup %823  ;;  %v588_v42 = vsel %vm587_vm13, %v820_v37, %v584_v5  ;;  %vm590_vm5 = vcmp.eq.f32.partialorder %v589_v50, 8.507059e+37  ;;  %vm604_vm6 = vcmp.eq.f32.partialorder %v603_v4, 8.507059e+37  ;;  %v659_v26 = vand.u32 2147483647, %v1397_v38 }
 0x1a5   :  { %718 = vst [vmem:[#allocation2 + $0x50] sm:$0xff] %v702_v3  ;;  %v602_v47 = vsel %vm601_vm1, %v822_v49, %v598_v41  ;;  %v593_v24 = vsel %vm590_vm5, %v592_v6, %v588_v42  ;;  %v651_v9 = vmul.f32 %v824_v13, %v1397_v38  ;;  %v661_v27 = vand.u32 2147483648, %v1397_v38 }
 0x1a6   :  { %v607_v19 = vsel %vm604_vm6, %v606_v14, %v602_v47  ;;  %v700_v7 = vmul.f32 %v593_v24, %v1272_v29  ;;  %v1430_v1 = vmax.f32 %v451_v12, 1e-30  ;;  %v1432_v45 = vmax.f32 %v449_v16, 1e-30 }
 0x1a7   :  { %v701_v22 = vmul.f32 %v607_v19, %v1278_v20  ;;  %v652_v40 = vsub.f32 1.0, %v651_v9  ;;  %v826_v10 = vpop.eup %825  ;;  %vm656_vm9 = vweird.f32 %v824_v13  ;;  %vm655_vm15 = vweird.f32 %v1397_v38 }
 0x1a8   :  { %716 = vst [vmem:[#allocation2 + $0x40] sm:$0xff] %v700_v7  ;;  %v637_v31 = vmul.f32 %v826_v10, %v1414_v44  ;;  %829 = vrcp.f32 %v1430_v1  ;;  %vm660_vm0 = vcmp.eq.f32.partialorder %v659_v26, 8.507059e+37  ;;  %v662_v33 = vor.u32 1.1754944e-38, %v661_v27  ;;  %vm657_vm7 = vmor %vm655_vm15, %vm656_vm9 }
 0x1a9   :  { %v828_v28 = vpop.eup %827  ;;  %717 = vst [vmem:[#allocation2 + $0x48] sm:$0xff] %v701_v22  ;;  %v653_v30 = vmul.f32 %v824_v13, %v652_v40  ;;  %831 = vrcp.f32 %v1432_v45  ;;  %v645_v34 = vand.u32 2147483647, %v1414_v44  ;;  %v647_v0 = vand.u32 2147483648, %v1414_v44 }
 0x1aa   :  { %v623_v29 = vmul.f32 %v828_v28, %v1416_v63  ;;  %v638_v46 = vsub.f32 1.0, %v637_v31  ;;  %v631_v25 = vand.u32 2147483647, %v1416_v63  ;;  %vm642_vm8 = vweird.f32 %v826_v10 }
 0x1ab   :  { %v654_v20 = vadd.f32 %v824_v13, %v653_v30  ;;  %v633_v17 = vand.u32 2147483648, %v1416_v63  ;;  %vm628_vm11 = vweird.f32 %v828_v28  ;;  %vm641_vm14 = vweird.f32 %v1414_v44 }
 0x1ac   :  { %v624_v35 = vsub.f32 1.0, %v623_v29  ;;  %v639_v37 = vmul.f32 %v826_v10, %v638_v46  ;;  %vm643_vm2 = vmor %vm641_vm14, %vm642_vm8  ;;  %v648_v52 = vor.u32 1.1754944e-38, %v647_v0  ;;  %vm627_vm3 = vweird.f32 %v1416_v63 }
 0x1ad   :  { %v658_v36 = vsel %vm657_vm7, %v824_v13, %v654_v20  ;;  %vm646_vm4 = vcmp.eq.f32.partialorder %v645_v34, 8.507059e+37  ;;  %vm629_vm10 = vmor %vm627_vm3, %vm628_vm11  ;;  %vm632_vm12 = vcmp.eq.f32.partialorder %v631_v25, 8.507059e+37  ;;  %v634_v53 = vor.u32 1.1754944e-38, %v633_v17 }
 0x1ae   :  { %v663_v43 = vsel %vm660_vm0, %v662_v33, %v658_v36  ;;  %v625_v59 = vmul.f32 %v828_v28, %v624_v35  ;;  %v830_v38 = vpop.eup %829  ;;  %v640_v49 = vadd.f32 %v826_v10, %v639_v37  ;;  %v687_v11 = vand.u32 2147483647, %v1430_v1 }
 0x1af   :  { %v705_v18 = vmul.f32 %v663_v43, %v1288_v48  ;;  %v679_v51 = vmul.f32 %v830_v38, %v1430_v1  ;;  %v832_v2 = vpop.eup %831  ;;  %v689_v61 = vand.u32 2147483648, %v1430_v1  ;;  %vm684_vm13 = vweird.f32 %v830_v38 }
 0x1b0   :  { %v626_v54 = vadd.f32 %v828_v28, %v625_v59  ;;  %v644_v32 = vsel %vm643_vm2, %v826_v10, %v640_v49  ;;  %v665_v58 = vmul.f32 %v832_v2, %v1432_v45  ;;  %vm683_vm1 = vweird.f32 %v1430_v1 }
 0x1b1   :  { %721 = vst [vmem:[#allocation2 + $0x68] sm:$0xff] %v705_v18  ;;  %v649_v56 = vsel %vm646_vm4, %v648_v52, %v644_v32  ;;  %v680_v48 = vsub.f32 1.0, %v679_v51  ;;  %v675_v63 = vand.u32 2147483648, %v1432_v45  ;;  %vm670_vm5 = vweird.f32 %v832_v2  ;;  %vm685_vm6 = vmor %vm683_vm1, %vm684_vm13 }
 0x1b2   :  { %v630_v57 = vsel %vm629_vm10, %v828_v28, %v626_v54  ;;  %v704_v50 = vmul.f32 %v649_v56, %v1294_v55  ;;  %v666_v44 = vsub.f32 1.0, %v665_v58  ;;  %v673_v55 = vand.u32 2147483647, %v1432_v45 }
 0x1b3   :  { %v635_v23 = vsel %vm632_vm12, %v634_v53, %v630_v57  ;;  %v681_v62 = vmul.f32 %v830_v38, %v680_v48  ;;  %v690_v4 = vor.u32 1.1754944e-38, %v689_v61  ;;  %vm688_vm9 = vcmp.eq.f32.partialorder %v687_v11, 8.507059e+37 }
 0x1b4   :  { %v703_v60 = vmul.f32 %v635_v23, %v1284_v15  ;;  %720 = vst [vmem:[#allocation2 + $0x60] sm:$0xff] %v704_v50  ;;  %v667_v8 = vmul.f32 %v832_v2, %v666_v44  ;;  %vm669_vm15 = vweird.f32 %v1432_v45  ;;  %v676_v6 = vor.u32 1.1754944e-38, %v675_v63 }
 0x1b5   :  { %v682_v3 = vadd.f32 %v830_v38, %v681_v62  ;;  %vm671_vm0 = vmor %vm669_vm15, %vm670_vm5  ;;  %vm674_vm7 = vcmp.eq.f32.partialorder %v673_v55, 8.507059e+37 }
 0x1b6   :  { %719 = vst [vmem:[#allocation2 + $0x58] sm:$0xff] %v703_v60  ;;  %v668_v41 = vadd.f32 %v832_v2, %v667_v8 }
 0x1b7   :  { %v686_v5 = vsel %vm685_vm6, %v830_v38, %v682_v3 }
 0x1b8   :  { %v691_v15 = vsel %vm688_vm9, %v690_v4, %v686_v5  ;;  %v672_v14 = vsel %vm671_vm0, %v832_v2, %v668_v41 }
 0x1b9   :  { %v707_v13 = vmul.f32 %v691_v15, %v1304_v21  ;;  %v677_v42 = vsel %vm674_vm7, %v676_v6, %v672_v14 }
 0x1ba   :  { %v706_v12 = vmul.f32 %v677_v42, %v1299_v39 }
 0x1bb   :  { %723 = vst [vmem:[#allocation2 + $0x78] sm:$0xff] %v707_v13 }
 0x1bc   :  { %722 = vst [vmem:[#allocation2 + $0x70] sm:$0xff] %v706_v12 }
 0x1bd   :  { %736 = dma.vmem_to_hbm [thread:$0]  %s729_s9, 2048, %s731_s12, [#allocation3], %s887_s7, %s887_s7, %s888_s8  }
 0x1be   :  { %881 = dma.done.wait [#allocation3], 2048  }
 0x1bf   :  { %882 = vsyncadd [#allocation3], 4294965248 }
 0x1c0   :  { %883 = dma.done.wait [#allocation5], 2048  }
 0x1c1   :  { %884 = vsyncadd [#allocation5], 4294965248 }
 0x1c2   :  { %758 = vsyncpa [#allocation3], 1 }
 0x1c3   :  { %759 = vsyncpa [#allocation5], 1 }

</bundles_post_ra>
